<compile_context>
chip_gen: v5e
topology: v5e:2x2
jax: 0.10.0
libtpu: 0.0.40
codegen_flags: <defaults>
</compile_context>

<pallas_src>
import functools

import jax
import jax.numpy as jnp
from jax.experimental import pallas as pl
from jax.experimental.pallas import tpu as pltpu

NEG_SLOPE = 0.01  # nn.LeakyReLU default negative_slope


def _fused_mlp_kernel(x_ref, *refs):
    """x_ref: (Nb, C0, T).  refs = (w0, b0, w1, b1, ..., o_ref).

    w_l: (C_out_l, C_in_l) f32, b_l: (C_out_l, 1) f32, o_ref: (Nb, C_last, T).
    """
    o_ref = refs[-1]
    wb = refs[:-1]
    n_layers = len(wb) // 2
    nb = x_ref.shape[0]

    # Weights/biases are tiny and grid-invariant: load once per step.
    ws = [wb[2 * l][...] for l in range(n_layers)]       # (C_out, C_in) f32
    bs = [wb[2 * l + 1][...] for l in range(n_layers)]   # (C_out, 1)   f32

    for i in range(nb):                                  # short static unroll
        h = x_ref[i].astype(jnp.float32)                 # (C_in, T) f32
        for l in range(n_layers):
            # MXU matmul, f32 accumulate; bias broadcasts along lanes.
            y = jnp.dot(ws[l], h, preferred_element_type=jnp.float32) + bs[l]
            # LeakyReLU with a single VALU op (0 < slope < 1 => max is exact).
            h = jnp.maximum(y, NEG_SLOPE * y)
        o_ref[i] = h.astype(o_ref.dtype)


def _choose_tiling(N, HW, c_in, c_last, c_max, x_bytes, out_bytes,
                   target_step_bytes, vmem_budget_bytes):
    """Pick (images-per-step nb, spatial lane tile, #spatial blocks)."""
    hbm_per_lane = c_in * x_bytes + c_last * out_bytes
    # double-buffered in/out blocks + ~2 live f32 intermediates per lane
    vmem_per_lane = 2 * (c_in * x_bytes + c_last * out_bytes) + 2 * c_max * 4
    lanes_step = min(
        max(128, vmem_budget_bytes // vmem_per_lane),
        max(128, target_step_bytes // hbm_per_lane),
    )

    if HW % 128 == 0:
        tile_hw = min(HW, max(128, (lanes_step // 128) * 128))
    elif HW * vmem_per_lane <= vmem_budget_bytes:
        tile_hw = HW  # full spatial extent per block (ragged-free, legal block)
    else:
        # Ragged last block: safe, contraction is over channels only.
        tile_hw = max(128, (lanes_step // 128) * 128)
    n_hw_blocks = pl.cdiv(HW, tile_hw)

    nb = 1
    if n_hw_blocks == 1:
        # Small images: fold several batch elements into one step, but keep
        # >= 2 grid programs (dual TensorCores) and nb dividing N exactly.
        nb = max(1, min(N, lanes_step // max(tile_hw, 1)))
        while nb > 1 and (N % nb != 0 or (N // nb) < 2):
            nb -= 1
    return nb, tile_hw, n_hw_blocks


def mlp_forward(x_nchw, params, *, out_dtype=jnp.float32,
                target_step_bytes=2 << 20, vmem_budget_bytes=24 << 20):
    """Fused MLP forward.

    x_nchw: (N, C0, H, W), any float dtype (f32 or bf16 HBM residency).
    params: tuple of (w, b) with w = (C_out, C_in) (squeezed 1x1 conv weight),
            b = (C_out,).
    Returns (N, C_last, H, W) in out_dtype.
    """
    N, C0, H, W = x_nchw.shape
    HW = H * W
    C_last = params[-1][0].shape[0]
    c_max = max([C0] + [w.shape[0] for (w, _) in params])
    x_bytes = jnp.dtype(x_nchw.dtype).itemsize
    out_bytes = jnp.dtype(out_dtype).itemsize

    nb, tile_hw, n_hw_blocks = _choose_tiling(
        N, HW, C0, C_last, c_max, x_bytes, out_bytes,
        target_step_bytes, vmem_budget_bytes)

    # NCHW has spatial last -> free reshape only; no pad / slice HBM passes.
    x3 = x_nchw.reshape(N, C0, HW)

    in_specs = [pl.BlockSpec((nb, C0, tile_hw), lambda bi, j: (bi, 0, j))]
    flat_wb = []
    for (w, b) in params:
        w_f32 = w.astype(jnp.float32)                  # (C_out, C_in), few KB
        b_col = b.reshape(-1, 1).astype(jnp.float32)   # (C_out, 1)
        flat_wb += [w_f32, b_col]
        # Full-array, grid-invariant blocks: fetched once, revisited every step.
        in_specs += [
            pl.BlockSpec(w_f32.shape, lambda bi, j: (0, 0)),
            pl.BlockSpec(b_col.shape, lambda bi, j: (0, 0)),
        ]

    out = pl.pallas_call(
        _fused_mlp_kernel,
        out_shape=jax.ShapeDtypeStruct((N, C_last, HW), out_dtype),
        grid_spec=pltpu.PrefetchScalarGridSpec(
            num_scalar_prefetch=0,
            grid=(N // nb, n_hw_blocks),
            in_specs=in_specs,
            out_specs=pl.BlockSpec((nb, C_last, tile_hw),
                                   lambda bi, j: (bi, 0, j)),
        ),
        compiler_params=pltpu.CompilerParams(
            dimension_semantics=("parallel", "parallel"),
            # Raise the scoped-VMEM ceiling so large tiles fit (stays well
            # under v7x's 64 MiB physical VMEM; plenty on v5e/v6e's 128 MiB).
            vmem_limit_bytes=48 * 1024 * 1024,
        ),
    )(x3, *flat_wb)
    return out.reshape(N, C_last, H, W)


def init_mlp_params(mlp_list, key):
    """Deterministic init mimicking nn.Conv2d(kernel_size=1) default init shapes."""
    params = []
    for i in range(len(mlp_list) - 1):
        c_in, c_out = mlp_list[i], mlp_list[i + 1]
        key, kw, kb = jax.random.split(key, 3)
        bound = 1.0 / (c_in ** 0.5)
        w = jax.random.uniform(kw, (c_out, c_in), jnp.float32, -bound, bound)
        b = jax.random.uniform(kb, (c_out,), jnp.float32, -bound, bound)
        params.append((w, b))
    return params


def ref_forward(x_nchw, params):
    """Plain-JAX reference of the same forward pass (f32)."""
    N, C, H, W = x_nchw.shape
    y = x_nchw.reshape(N, C, H * W).astype(jnp.float32)
    for (w, b) in params:
        y = jnp.einsum("oc,ncs->nos", w, y) + b[None, :, None]
        y = jnp.where(y >= 0.0, y, NEG_SLOPE * y)
    return y.reshape(N, -1, H, W)


if __name__ == "__main__":
    key = jax.random.PRNGKey(0)
    kx, kp = jax.random.split(key)

    # MLP([4, 32, 16]) — matches the module's layer structure.
    mlp_list = [4, 32, 16]
    params = tuple(init_mlp_params(mlp_list, kp))

    # f32 path on (2, 4, 16, 16): exact match to the PyTorch module's numerics.
    x = jax.random.normal(kx, (2, 4, 16, 16), dtype=jnp.float32)
    out = jax.block_until_ready(jax.jit(mlp_forward)(x, params))
    ref = ref_forward(x, params)
    assert out.shape == (2, mlp_list[-1], 16, 16)
    assert jnp.allclose(out, ref, atol=1e-5, rtol=1e-5)

    # Non-128-multiple spatial extent: full-HW blocks, still no pad/slice pass.
    x2 = jax.random.normal(kx, (2, 4, 20, 20), dtype=jnp.float32)
    out2 = jax.block_until_ready(jax.jit(mlp_forward)(x2, params))
    assert jnp.allclose(out2, ref_forward(x2, params), atol=1e-5, rtol=1e-5)

    # bf16 HBM-resident activations in/out; in-kernel math stays f32 (no
    # per-layer re-rounding), so only HBM bytes change.
    x_bf16 = x.astype(jnp.bfloat16)
    fwd_bf16 = jax.jit(functools.partial(mlp_forward, out_dtype=jnp.bfloat16))
    out_bf16 = jax.block_until_ready(fwd_bf16(x_bf16, params))
    ref_bf_in = ref_forward(x_bf16.astype(jnp.float32), params)
    assert out_bf16.dtype == jnp.bfloat16
    assert float(jnp.max(jnp.abs(out_bf16.astype(jnp.float32) - ref_bf_in))) < 0.05

    print("KERNEL_OK")
</pallas_src>

<mosaic_0001>
module attributes {stable_mosaic.version = 11 : i64} {
  func.func @_fused_mlp_kernel(%arg0: i32, %arg1: i32, %arg2: memref<1x4x256xf32, #tpu.memory_space<vmem>>, %arg3: memref<32x4xf32, #tpu.memory_space<vmem>>, %arg4: memref<32x1xf32, #tpu.memory_space<vmem>>, %arg5: memref<16x32xf32, #tpu.memory_space<vmem>>, %arg6: memref<16x1xf32, #tpu.memory_space<vmem>>, %arg7: memref<1x16x256xf32, #tpu.memory_space<vmem>>) attributes {dimension_semantics = [#tpu.dimension_semantics<parallel>, #tpu.dimension_semantics<parallel>], iteration_bounds = array<i64: 2, 1>, scalar_prefetch = 0 : i64, scratch_operands = 0 : i64, tpu.core_type = #tpu.core_type<tc>, window_params = [{transform_indices = @transform_0, window_bounds = array<i64: 1, 4, 256>}, {pipeline_mode = #tpu.pipeline_mode<synchronous>, transform_indices = @transform_1, window_bounds = array<i64: 32, 4>}, {pipeline_mode = #tpu.pipeline_mode<synchronous>, transform_indices = @transform_2, window_bounds = array<i64: 32, 1>}, {pipeline_mode = #tpu.pipeline_mode<synchronous>, transform_indices = @transform_3, window_bounds = array<i64: 16, 32>}, {pipeline_mode = #tpu.pipeline_mode<synchronous>, transform_indices = @transform_4, window_bounds = array<i64: 16, 1>}, {transform_indices = @transform_5, window_bounds = array<i64: 1, 16, 256>}]} {
    %c0 = arith.constant 0 : index
    %c0_0 = arith.constant 0 : index
    %0 = vector.load %arg3[%c0, %c0_0] : memref<32x4xf32, #tpu.memory_space<vmem>>, vector<32x4xf32>
    %c0_1 = arith.constant 0 : index
    %c0_2 = arith.constant 0 : index
    %1 = vector.load %arg5[%c0_1, %c0_2] : memref<16x32xf32, #tpu.memory_space<vmem>>, vector<16x32xf32>
    %c0_3 = arith.constant 0 : index
    %c0_4 = arith.constant 0 : index
    %2 = vector.load %arg4[%c0_3, %c0_4] : memref<32x1xf32, #tpu.memory_space<vmem>>, vector<32x1xf32>
    %c0_5 = arith.constant 0 : index
    %c0_6 = arith.constant 0 : index
    %3 = vector.load %arg6[%c0_5, %c0_6] : memref<16x1xf32, #tpu.memory_space<vmem>>, vector<16x1xf32>
    %c0_7 = arith.constant 0 : index
    %c0_8 = arith.constant 0 : index
    %c0_9 = arith.constant 0 : index
    %4 = vector.load %arg2[%c0_7, %c0_8, %c0_9] : memref<1x4x256xf32, #tpu.memory_space<vmem>>, vector<1x4x256xf32>
    %5 = vector.shape_cast %4 : vector<1x4x256xf32> to vector<4x256xf32>
    %cst = arith.constant dense<0.000000e+00> : vector<32x256xf32>
    %6 = tpu.matmul %0, %5, %cst {dimension_numbers = #tpu.dot_dimension_numbers<[1], [0], [0], [1], [0, 0, 1, 1], [], []>} : vector<32x4xf32>, vector<4x256xf32>, vector<32x256xf32> -> vector<32x256xf32>
    %7 = vector.broadcast %2 : vector<32x1xf32> to vector<32x256xf32>
    %8 = arith.addf %6, %7 : vector<32x256xf32>
    %cst_10 = arith.constant 0.00999999977 : f32
    %9 = vector.broadcast %cst_10 : f32 to vector<32x256xf32>
    %10 = arith.mulf %9, %8 : vector<32x256xf32>
    %11 = arith.maximumf %8, %10 : vector<32x256xf32>
    %cst_11 = arith.constant dense<0.000000e+00> : vector<16x256xf32>
    %12 = tpu.matmul %1, %11, %cst_11 {dimension_numbers = #tpu.dot_dimension_numbers<[1], [0], [0], [1], [0, 0, 1, 1], [], []>} : vector<16x32xf32>, vector<32x256xf32>, vector<16x256xf32> -> vector<16x256xf32>
    %13 = vector.broadcast %3 : vector<16x1xf32> to vector<16x256xf32>
    %14 = arith.addf %12, %13 : vector<16x256xf32>
    %cst_12 = arith.constant 0.00999999977 : f32
    %15 = vector.broadcast %cst_12 : f32 to vector<16x256xf32>
    %16 = arith.mulf %15, %14 : vector<16x256xf32>
    %17 = arith.maximumf %14, %16 : vector<16x256xf32>
    %c0_13 = arith.constant 0 : index
    %c0_14 = arith.constant 0 : index
    %c0_15 = arith.constant 0 : index
    %18 = vector.load %arg7[%c0_13, %c0_14, %c0_15] : memref<1x16x256xf32, #tpu.memory_space<vmem>>, vector<1x16x256xf32>
    %19 = vector.shape_cast %18 : vector<1x16x256xf32> to vector<16x256xf32>
    %20 = vector.shape_cast %17 : vector<16x256xf32> to vector<1x16x256xf32>
    tpu.vector_store %arg7[%c0_13, %c0_14, %c0_15], %20 {strides = array<i32>} : memref<1x16x256xf32, #tpu.memory_space<vmem>>, vector<1x16x256xf32>,
    return
  }
  func.func @transform_0(%arg0: i32, %arg1: i32) -> (i32, i32, i32) {
    %c0_i32 = arith.constant 0 : i32
    %c0_i32_0 = arith.constant 0 : i32
    return %arg0, %c0_i32, %arg1 : i32, i32, i32
  }
  func.func @transform_1(%arg0: i32, %arg1: i32) -> (i32, i32) {
    %c0_i32 = arith.constant 0 : i32
    %c0_i32_0 = arith.constant 0 : i32
    %c0_i32_1 = arith.constant 0 : i32
    return %c0_i32, %c0_i32_0 : i32, i32
  }
  func.func @transform_2(%arg0: i32, %arg1: i32) -> (i32, i32) {
    %c0_i32 = arith.constant 0 : i32
    %c0_i32_0 = arith.constant 0 : i32
    %c0_i32_1 = arith.constant 0 : i32
    return %c0_i32, %c0_i32_0 : i32, i32
  }
  func.func @transform_3(%arg0: i32, %arg1: i32) -> (i32, i32) {
    %c0_i32 = arith.constant 0 : i32
    %c0_i32_0 = arith.constant 0 : i32
    %c0_i32_1 = arith.constant 0 : i32
    return %c0_i32, %c0_i32_0 : i32, i32
  }
  func.func @transform_4(%arg0: i32, %arg1: i32) -> (i32, i32) {
    %c0_i32 = arith.constant 0 : i32
    %c0_i32_0 = arith.constant 0 : i32
    %c0_i32_1 = arith.constant 0 : i32
    return %c0_i32, %c0_i32_0 : i32, i32
  }
  func.func @transform_5(%arg0: i32, %arg1: i32) -> (i32, i32, i32) {
    %c0_i32 = arith.constant 0 : i32
    %c0_i32_0 = arith.constant 0 : i32
    return %arg0, %c0_i32, %arg1 : i32, i32, i32
  }
}

</mosaic_0001>

<bundles_post_ra>
// kernel: mlp_forward.1
= control target key start
LH: loop header
LB: loop body
LE: loop exit
PB: predicated region body
PF: predicated region fallthrough
CT: control target
= control target key end

     0   :  { %s665_s18 = smov 0   ;;  %s667_s19 = smov 0   ;;  %s738_s0 = inlined_call_operand.vmem [shape: f32[2,4,256], index: 0, kind: input, shape index: {}]   ;;  %s739_s1 = inlined_call_operand.vmem [shape: f32[32,4], index: 1, kind: input, shape index: {}]   ;;  %s740_s2 = inlined_call_operand.vmem [shape: f32[32,1], index: 2, kind: input, shape index: {}]   ;;  %s741_s3 = inlined_call_operand.vmem [shape: f32[16,32], index: 3, kind: input, shape index: {}]   ;;  %s742_s4 = inlined_call_operand.vmem [shape: f32[16,1], index: 4, kind: input, shape index: {}]   ;;  %s743_s5 = inlined_call_operand.vmem [shape: f32[2,16,256], index: 5, kind: output, shape index: {}]  }
   0x1   :  { %s669_s20 = smov 0  }
   0x2 LB: > { %s27_s21 = sadd.s32 1, %s628_s19  ;;  %p559_p0 = scmp.ge.s32.totalorder %s632_s20, 1  ;;  %s632_s20 = sphi %s669_s20, %s15_s20   ;;  %s628_s19 = sphi %s667_s19, %s745_s19   ;;  %s624_s18 = sphi %s665_s18, %s744_s18  }
   0x3   : > { %p29_p1 = scmp.ge.s32.totalorder %s27_s21, 2  ;;  %p208_p2 = scmp.lt.s32.totalorder %s632_s20, 3 }
   0x5   : > { %s747_s21 = smov (%p29_p1, %s27_s21), 0  ;;  %p209_p3 = pnand %p559_p0, %p208_p2 }
   0x6   : > { %p245_p4 = scmp.lt.s32.totalorder (!%p209_p3), %s624_s18, 1 }
   0x7   : > { %212 = sbr.rel (%p209_p3) target bundleno = 336 (0x150), region = 40 }
   0xc   : > { %v271_v0 = vld [vmem:[%s740_s2 + $0x8] sm:$0xff]  ;;  %v634_v1 = vmov 0   ;;  %s749_s18 = smov (!%p245_p4, %s624_s18), 1  ;;  %v273_v2 = vld [vmem:[%s740_s2 + $0x18] sm:$0xff]  ;;  %v270_v4 = vld [vmem:[%s740_s2] sm:$0xff]  ;;  %vm314_vm0 = vcmask 1043456  }
   0xd   : > { %608 = vset.pattern.permute.xlu1 %v634_v1  ;;  %607 = vset.pattern.permute.xlu0 %v634_v1  ;;  %s580_s26 = sshll.u32 %s749_s18, 3  ;;  %v272_v5 = vld [vmem:[%s740_s2 + $0x10] sm:$0xff]  ;;  %v264_v6 = vld [vmem:[%s739_s1] sm:$0xff]  ;;  %vm301_vm1 = vcmask 31744   ;;  %v265_v9 = vld [vmem:[%s739_s1 + $0x8] sm:$0xff]  ;;  %vm403_vm2 = vcmask 261120  }
   0xe   : > { %284 = vperm.xlu1 %608, %v271_v0   ;;  %609 = vset.pattern.permute.xlu2 %v634_v1  ;;  %s252_s29 = scalar_lea.vmem %s738_s0, %s580_s26  ;;  %v266_v10 = vld [vmem:[%s739_s1 + $0x10] sm:$0xff]  ;;  %v267_v11 = vld [vmem:[%s739_s1 + $0x18] sm:$0xff]  ;;  %v274_v18 = vld [vmem:[%s742_s4] sm:$0xff] }
   0xf   : > { %294 = vperm.xlu0 %607, %v273_v2   ;;  %v276_v3 = vld [vmem:[%s252_s29] sm:$0xff]  ;;  %395 = vperm.xlu2 %609, %v274_v18   ;;  %v275_v22 = vld [vmem:[%s742_s4 + $0x8] sm:$0xff]  ;;  %s581_s29 = sshll.u32 %s749_s18, 5 }
  0x10   : > { %298 = vst [vmem:[#allocation1] ss:$2 sm:$0xff] %v276_v3  ;;  %v268_v50 = vld [vmem:[%s741_s3] sm:$0xff]  ;;  %v269_v51 = vld [vmem:[%s741_s3 + $0x8] sm:$0xff]  ;;  %s262_s7 = scalar_lea.vmem %s743_s5, %s581_s29 }
  0x16   : > { %279 = vperm.xlu1 %608, %v270_v4  }
  0x17   : > { %289 = vperm.xlu0 %607, %v272_v5   ;;  %v299_v7 = vld.sshfl [vmem:[#allocation1] sm:$0xff pattern:$0x75316420]  ;;  %v300_v8 = vld.sshfl [vmem:[#allocation1 + $0x8] sm:$0xff pattern:$0x75316420]  ;;  %400 = vperm.xlu2 %609, %v275_v22  }
  0x18   : > { %564 = vmatpush.msk.msra.mxu0 %vm314_vm0, %v299_v7  ;;  %569 = vmatpush.msk.msra.mxu1 %vm314_vm0, %v300_v8 }
  0x19   : > { %565 = vmatmul.msk.f32.vlgmr.msra.gmra.mxu0 %vm301_vm1, %v264_v6  ;;  %570 = vmatmul.msk.f32.vlgmr.msra.gmra.mxu1 %vm301_vm1, %v264_v6 }
  0x21   : > { %566 = vmatmul.msk.f32.gmra.mxu0 %vm301_vm1, %v265_v9  ;;  %571 = vmatmul.msk.f32.gmra.mxu1 %vm301_vm1, %v265_v9 }
  0x29   : > { %567 = vmatmul.msk.f32.gmra.mxu0 %vm301_vm1, %v266_v10  ;;  %572 = vmatmul.msk.f32.gmra.mxu1 %vm301_vm1, %v266_v10 }
  0x31   : > { %568 = vmatmul.msk.f32.gmra.mxu0 %vm301_vm1, %v267_v11  ;;  %573 = vmatmul.msk.f32.gmra.mxu1 %vm301_vm1, %v267_v11 }
  0x69   : > { %v396_v52 = vpop.permute.xlu2 %395 }
  0x71   : > { %v401_v61 = vpop.permute.xlu2 %400 }
  0x80   : > { %v285_v17 = vpop.permute.xlu1 %284 }
  0x81   : > { %v295_v16 = vpop.permute.xlu0 %294 }
  0x88   : > { %v280_v24 = vpop.permute.xlu1 %279 }
  0x89   : > { %v290_v21 = vpop.permute.xlu0 %289 }
  0x96   : > { %v336_v12 = vpop.f32.mrf.mxu0  ;;  %v365_v13 = vpop.f32.mrf.mxu1 }
  0x97   : > { %v337_v32 = vadd.f32 %v336_v12, %v280_v24  ;;  %v366_v34 = vadd.f32 %v365_v13, %v280_v24 }
  0x99   : > { %v377_v42 = vmul.f32 0.01, %v337_v32  ;;  %v378_v43 = vmul.f32 0.01, %v366_v34 }
  0x9b   : > { %v385_v48 = vmax.f32 %v337_v32, %v377_v42  ;;  %v386_v49 = vmax.f32 %v366_v34, %v378_v43 }
  0x9e   : > { %v339_v14 = vpop.f32.mrf.mxu0  ;;  %v368_v15 = vpop.f32.mrf.mxu1 }
  0x9f   : > { %v340_v28 = vadd.f32 %v339_v14, %v285_v17  ;;  %v369_v29 = vadd.f32 %v368_v15, %v285_v17 }
  0xa1   : > { %v379_v38 = vmul.f32 0.01, %v340_v28  ;;  %v380_v39 = vmul.f32 0.01, %v369_v29 }
  0xa3   : > { %v387_v46 = vmax.f32 %v340_v28, %v379_v38  ;;  %v388_v47 = vmax.f32 %v369_v29, %v380_v39 }
  0xa6   : > { %v342_v19 = vpop.f32.mrf.mxu0  ;;  %v371_v20 = vpop.f32.mrf.mxu1 }
  0xa7   : > { %v343_v23 = vadd.f32 %v342_v19, %v290_v21  ;;  %v372_v25 = vadd.f32 %v371_v20, %v290_v21 }
  0xa9   : > { %v381_v33 = vmul.f32 0.01, %v343_v23  ;;  %v382_v35 = vmul.f32 0.01, %v372_v25 }
  0xab   : > { %v389_v44 = vmax.f32 %v343_v23, %v381_v33  ;;  %v390_v45 = vmax.f32 %v372_v25, %v382_v35 }
  0xae   : > { %v345_v26 = vpop.f32.mrf.mxu0  ;;  %v374_v27 = vpop.f32.mrf.mxu1 }
  0xaf   : > { %v346_v30 = vadd.f32 %v345_v26, %v295_v16  ;;  %v375_v31 = vadd.f32 %v374_v27, %v295_v16 }
  0xb1   : > { %v383_v36 = vmul.f32 0.01, %v346_v30  ;;  %v384_v37 = vmul.f32 0.01, %v375_v31 }
  0xb3   : > { %v391_v40 = vmax.f32 %v346_v30, %v383_v36  ;;  %v392_v41 = vmax.f32 %v375_v31, %v384_v37 }
  0xb5   : > { %422 = vmatpush.msra.mxu2 %v391_v40  ;;  %445 = vmatpush.msra.mxu3 %v392_v41 }
  0xb7   : > { %423 = vmatpush.msra.mxu2 %v389_v44  ;;  %446 = vmatpush.msra.mxu3 %v390_v45 }
  0xb9   : > { %424 = vmatpush.msra.mxu2 %v387_v46  ;;  %447 = vmatpush.msra.mxu3 %v388_v47 }
  0xbb   : > { %425 = vmatpush.msra.mxu2 %v385_v48  ;;  %448 = vmatpush.msra.mxu3 %v386_v49 }
  0xbc   : > { %574 = vmatmul.msk.f32.vlgmr.msra.gmra.mxu2 %vm403_vm2, %v268_v50  ;;  %576 = vmatmul.msk.f32.vlgmr.msra.gmra.mxu3 %vm403_vm2, %v268_v50 }
  0xc4   : > { %575 = vmatmul.msk.f32.gmra.mxu2 %vm403_vm2, %v269_v51  ;;  %577 = vmatmul.msk.f32.gmra.mxu3 %vm403_vm2, %v269_v51 }
 0x13f   : > { %v427_v53 = vpop.f32.mrf.mxu2  ;;  %v450_v54 = vpop.f32.mrf.mxu3 }
 0x140   : > { %v428_v55 = vadd.f32 %v427_v53, %v396_v52  ;;  %v451_v56 = vadd.f32 %v450_v54, %v396_v52 }
 0x142   : > { %v456_v57 = vmul.f32 0.01, %v428_v55  ;;  %v457_v58 = vmul.f32 0.01, %v451_v56 }
 0x144   : > { %v460_v59 = vmax.f32 %v428_v55, %v456_v57  ;;  %v461_v60 = vmax.f32 %v451_v56, %v457_v58 }
 0x146   : > { %464 = vst [vmem:[%s262_s7] sm:$0xff] %v460_v59 }
 0x147   : > { %465 = vst [vmem:[%s262_s7 + $0x8] sm:$0xff] %v461_v60  ;;  %v430_v62 = vpop.f32.mrf.mxu2  ;;  %v453_v63 = vpop.f32.mrf.mxu3 }
 0x148   : > { %v431_v0 = vadd.f32 %v430_v62, %v401_v61  ;;  %v454_v1 = vadd.f32 %v453_v63, %v401_v61 }
 0x14a   : > { %v458_v2 = vmul.f32 0.01, %v431_v0  ;;  %v459_v3 = vmul.f32 0.01, %v454_v1 }
 0x14c   : > { %v462_v4 = vmax.f32 %v431_v0, %v458_v2  ;;  %v463_v5 = vmax.f32 %v454_v1, %v459_v3 }
 0x14e   : > { %466 = vst [vmem:[%s262_s7 + $0x10] sm:$0xff] %v462_v4 }
 0x14f   : > { %467 = vst [vmem:[%s262_s7 + $0x18] sm:$0xff] %v463_v5 }
 0x150 PF: > { %s15_s20 = sadd.s32 1, %s632_s20   ;;  %s744_s18 = smov %s628_s19 }
 0x151   : > { %p12_p5 = scmp.ge.s32.totalorder %s15_s20, 4   ;;  %s745_s19 = smov %s747_s21 }
 0x153   :  { %14 = sbr.rel (!%p12_p5) target bundleno = 2 (0x2), region = 70 }

</bundles_post_ra>
